<compile_context>
chip_gen: v7x
topology: tpu7x:2x2x1
jax: 0.10.0
libtpu: 0.0.40
codegen_flags: <defaults>
</compile_context>

<pallas_src>
import functools

import jax
import jax.numpy as jnp
import numpy as np
from jax.experimental import pallas as pl
from jax.experimental.pallas import tpu as pltpu


def _mean_conv1x1_kernel(x_ref, w_ref, b_ref, o_ref, *, inv_hw):
    # x_ref: (1, C, HW)  one batch element, spatial flattened onto lanes
    # w_ref: (CO, C)     native PyTorch conv-weight layout (out, in)
    # b_ref: (CO, 1)
    # o_ref: (CO, 1)
    x = x_ref[0]                                                  # (C, HW)
    # (CO, C) @ (C, HW) -> (CO, HW): plain MXU matmul, f32 accumulation,
    # no operand transposes.
    y = jnp.dot(w_ref[...], x, preferred_element_type=jnp.float32)
    # Global average pool == mean over HW of the per-pixel 1x1-conv outputs.
    # (40, 196) is only ~10 vregs, so this reduce is negligible.
    m = jnp.sum(y, axis=-1, keepdims=True) * inv_hw               # (CO, 1) f32
    o_ref[...] = (m + b_ref[...].astype(jnp.float32)).astype(o_ref.dtype)


def mean_conv2d_1x1(x_nchw, weight, bias):
    """x_nchw: (N, C, H, W); weight: (CO, C, 1, 1); bias: (CO,).

    Returns (N, CO, 1, 1), matching
      Conv2d(C, CO, 1)(x.mean((2, 3), keepdim=True)).
    """
    N, C, H, W = x_nchw.shape
    CO = weight.shape[0]
    HW = H * W

    # Free, contiguous reshapes only -- no dtype casts, no transposes.
    x3d = x_nchw.reshape(N, C, HW)
    w2d = weight.reshape(CO, C)
    b2d = bias.reshape(CO, 1)

    out_dtype = x_nchw.dtype
    nbytes = lambda a: int(a.size) * a.dtype.itemsize
    cost = pl.CostEstimate(
        flops=2 * N * CO * C * HW + 2 * N * CO * HW,
        transcendentals=0,
        bytes_accessed=nbytes(x3d) + nbytes(w2d) + nbytes(b2d)
        + N * CO * jnp.dtype(out_dtype).itemsize,
    )

    kernel = functools.partial(_mean_conv1x1_kernel, inv_hw=1.0 / HW)

    # Note: this squeeze step is fixed-overhead bound on v7x; when assembling
    # the full SE block it should be fused with the adjacent excite matmul /
    # producing conv rather than micro-tuned further as a standalone kernel.
    out = pl.pallas_call(
        kernel,
        out_shape=jax.ShapeDtypeStruct((CO, N), out_dtype),
        grid=(N,),
        in_specs=[
            pl.BlockSpec((1, C, HW), lambda n: (n, 0, 0)),
            pl.BlockSpec((CO, C), lambda n: (0, 0)),
            pl.BlockSpec((CO, 1), lambda n: (0, 0)),
        ],
        out_specs=pl.BlockSpec((CO, 1), lambda n: (0, n)),
        compiler_params=pltpu.CompilerParams(
            dimension_semantics=("parallel",)),
        cost_estimate=cost,
    )(x3d, w2d, b2d)

    # (CO, N) -> (N, CO, 1, 1): tiny (N*CO-element) layout fixup.
    return out.T.reshape(N, CO, 1, 1)


if __name__ == "__main__":
    key = jax.random.PRNGKey(0)
    kx, kw, kb = jax.random.split(key, 3)

    # shapes implied by the module's forward: (1, 960, 14, 14) -> (1, 40, 1, 1)
    N, C, H, W, CO = 1, 960, 14, 14, 40

    x = jax.random.normal(kx, (N, C, H, W), dtype=jnp.float32)

    # deterministic Conv2d-style init (uniform in +/- 1/sqrt(fan_in))
    bound = 1.0 / np.sqrt(C)
    weight = jax.random.uniform(kw, (CO, C, 1, 1), jnp.float32, -bound, bound)
    bias = jax.random.uniform(kb, (CO,), jnp.float32, -bound, bound)

    y = mean_conv2d_1x1(x, weight, bias)
    y = jax.block_until_ready(y)

    # reference check in plain JAX (mean-then-matmul form)
    ref = (x.mean(axis=(2, 3)) @ weight.reshape(CO, C).T + bias).reshape(N, CO, 1, 1)
    assert y.shape == (N, CO, 1, 1)
    assert np.allclose(np.asarray(y), np.asarray(ref), rtol=1e-4, atol=1e-4)

    print("KERNEL_OK")
</pallas_src>

<mosaic_0001>
module attributes {stable_mosaic.version = 11 : i64} {
  func.func @_mean_conv1x1_kernel(%arg0: i32, %arg1: memref<1x960x196xf32, #tpu.memory_space<vmem>>, %arg2: memref<40x960xf32, #tpu.memory_space<vmem>>, %arg3: memref<40x1xf32, #tpu.memory_space<vmem>>, %arg4: memref<40x1xf32, #tpu.memory_space<vmem>>) attributes {dimension_semantics = [#tpu.dimension_semantics<parallel>], iteration_bounds = array<i64: 1>, scalar_prefetch = 0 : i64, scratch_operands = 0 : i64, tpu.core_type = #tpu.core_type<tc>, window_params = [{transform_indices = @transform_0, window_bounds = array<i64: 1, 960, 196>}, {pipeline_mode = #tpu.pipeline_mode<synchronous>, transform_indices = @transform_1, window_bounds = array<i64: 40, 960>}, {pipeline_mode = #tpu.pipeline_mode<synchronous>, transform_indices = @transform_2, window_bounds = array<i64: 40, 1>}, {transform_indices = @transform_3, window_bounds = array<i64: 40, 1>}]} {
    %c0 = arith.constant 0 : index
    %c0_0 = arith.constant 0 : index
    %c0_1 = arith.constant 0 : index
    %0 = vector.load %arg1[%c0, %c0_0, %c0_1] : memref<1x960x196xf32, #tpu.memory_space<vmem>>, vector<1x960x196xf32>
    %1 = vector.shape_cast %0 : vector<1x960x196xf32> to vector<960x196xf32>
    %c0_2 = arith.constant 0 : index
    %c0_3 = arith.constant 0 : index
    %2 = vector.load %arg2[%c0_2, %c0_3] : memref<40x960xf32, #tpu.memory_space<vmem>>, vector<40x960xf32>
    %cst = arith.constant dense<0.000000e+00> : vector<40x196xf32>
    %3 = tpu.matmul %2, %1, %cst {dimension_numbers = #tpu.dot_dimension_numbers<[1], [0], [0], [1], [0, 0, 1, 1], [], []>} : vector<40x960xf32>, vector<960x196xf32>, vector<40x196xf32> -> vector<40x196xf32>
    %cst_4 = arith.constant dense<0.000000e+00> : vector<40xf32>
    %4 = vector.multi_reduction <add>, %3, %cst_4 [1] : vector<40x196xf32> to vector<40xf32>
    %5 = vector.shape_cast %4 : vector<40xf32> to vector<40x1xf32>
    %cst_5 = arith.constant 0.00510204071 : f32
    %6 = vector.broadcast %cst_5 : f32 to vector<40x1xf32>
    %7 = arith.mulf %5, %6 : vector<40x1xf32>
    %c0_6 = arith.constant 0 : index
    %c0_7 = arith.constant 0 : index
    %8 = vector.load %arg3[%c0_6, %c0_7] : memref<40x1xf32, #tpu.memory_space<vmem>>, vector<40x1xf32>
    %9 = arith.addf %7, %8 : vector<40x1xf32>
    %c0_8 = arith.constant 0 : index
    %c0_9 = arith.constant 0 : index
    %10 = vector.load %arg4[%c0_8, %c0_9] : memref<40x1xf32, #tpu.memory_space<vmem>>, vector<40x1xf32>
    tpu.vector_store %arg4[%c0_8, %c0_9], %9 {strides = array<i32>} : memref<40x1xf32, #tpu.memory_space<vmem>>, vector<40x1xf32>,
    return
  }
  func.func @transform_0(%arg0: i32) -> (i32, i32, i32) {
    %c0_i32 = arith.constant 0 : i32
    %c0_i32_0 = arith.constant 0 : i32
    %c0_i32_1 = arith.constant 0 : i32
    return %arg0, %c0_i32, %c0_i32_0 : i32, i32, i32
  }
  func.func @transform_1(%arg0: i32) -> (i32, i32) {
    %c0_i32 = arith.constant 0 : i32
    %c0_i32_0 = arith.constant 0 : i32
    %c0_i32_1 = arith.constant 0 : i32
    return %c0_i32, %c0_i32_0 : i32, i32
  }
  func.func @transform_2(%arg0: i32) -> (i32, i32) {
    %c0_i32 = arith.constant 0 : i32
    %c0_i32_0 = arith.constant 0 : i32
    %c0_i32_1 = arith.constant 0 : i32
    return %c0_i32, %c0_i32_0 : i32, i32
  }
  func.func @transform_3(%arg0: i32) -> (i32, i32) {
    %c0_i32 = arith.constant 0 : i32
    %c0_i32_0 = arith.constant 0 : i32
    return %c0_i32, %arg0 : i32, i32
  }
}

</mosaic_0001>

<bundles_post_ra>
// kernel: tpu_custom_call.1
= control target key start
LH: loop header
LB: loop body
LE: loop exit
PB: predicated region body
PF: predicated region fallthrough
CT: control target
= control target key end

     0   :  { %vm294_vm0 = vcmask 523264   ;;  %vm690_vm1 = vcmask 556032   ;;  %vm726_vm2 = vcmask 7168   ;;  %s1916_s0 = inlined_call_operand.vmem [shape: f32[1,960,196], index: 0, kind: input, shape index: {}]   ;;  %s1917_s1 = inlined_call_operand.vmem [shape: f32[40,960], index: 1, kind: input, shape index: {}]   ;;  %s1918_s2 = inlined_call_operand.vmem [shape: f32[40,1], index: 2, kind: input, shape index: {}]   ;;  %s1919_s3 = inlined_call_operand.vmem [shape: f32[40,1], index: 3, kind: output, shape index: {}]  }
   0x1   :  { %v15_v0 = vld [vmem:[%s1916_s0 + $0x8] sm:$0xff]  ;;  %v17_v1 = vld [vmem:[%s1916_s0 + $0x18] sm:$0xff]  ;;  %v14_v5 = vld [vmem:[%s1916_s0] sm:$0xff] }
   0x2   :  { %v143_v2 = vld [vmem:[%s1916_s0 + $0x408] sm:$0xff]  ;;  %v741_v3 = vpack.c.bf16 %v17_v1, %v15_v0  ;;  %v145_v4 = vld [vmem:[%s1916_s0 + $0x418] sm:$0xff]  ;;  %v16_v6 = vld [vmem:[%s1916_s0 + $0x10] sm:$0xff] }
   0x3   :  { %v869_v7 = vpack.c.bf16 %v145_v4, %v143_v2  ;;  %v743_v8 = vpack.c.bf16 %v16_v6, %v14_v5  ;;  %v142_v9 = vld [vmem:[%s1916_s0 + $0x400] sm:$0xff]  ;;  %v144_v10 = vld [vmem:[%s1916_s0 + $0x410] sm:$0xff]  ;;  %v19_v11 = vld [vmem:[%s1916_s0 + $0x28] sm:$0xff] }
   0x4   :  { %742 = vmatprep.subr.bf16.mxu1 %v741_v3  ;;  %v871_v12 = vpack.c.bf16 %v144_v10, %v142_v9  ;;  %v21_v13 = vld [vmem:[%s1916_s0 + $0x38] sm:$0xff]  ;;  %v147_v14 = vld [vmem:[%s1916_s0 + $0x428] sm:$0xff]  ;;  %v18_v18 = vld [vmem:[%s1916_s0 + $0x20] sm:$0xff] }
   0x5   :  { %v149_v15 = vld [vmem:[%s1916_s0 + $0x438] sm:$0xff]  ;;  %870 = vmatprep.subr.bf16.mxu0 %v869_v7  ;;  %744 = vmatpush1.bf16.msra.mxu1 %v743_v8  ;;  %v745_v16 = vpack.c.bf16 %v21_v13, %v19_v11  ;;  %v20_v19 = vld [vmem:[%s1916_s0 + $0x30] sm:$0xff]  ;;  %v146_v20 = vld [vmem:[%s1916_s0 + $0x420] sm:$0xff] }
   0x6   :  { %v873_v17 = vpack.c.bf16 %v149_v15, %v147_v14  ;;  %872 = vmatpush1.bf16.msra.mxu0 %v871_v12  ;;  %v747_v21 = vpack.c.bf16 %v20_v19, %v18_v18  ;;  %v148_v22 = vld [vmem:[%s1916_s0 + $0x430] sm:$0xff]  ;;  %v23_v23 = vld [vmem:[%s1916_s0 + $0x48] sm:$0xff]  ;;  %v25_v24 = vld [vmem:[%s1916_s0 + $0x58] sm:$0xff] }
   0x7   :  { %746 = vmatprep.subr.bf16.mxu1 %v745_v16  ;;  %v875_v25 = vpack.c.bf16 %v148_v22, %v146_v20  ;;  %v749_v26 = vpack.c.bf16 %v25_v24, %v23_v23  ;;  %v151_v27 = vld [vmem:[%s1916_s0 + $0x448] sm:$0xff]  ;;  %v153_v28 = vld [vmem:[%s1916_s0 + $0x458] sm:$0xff]  ;;  %v22_v29 = vld [vmem:[%s1916_s0 + $0x40] sm:$0xff] }
   0x8   :  { %874 = vmatprep.subr.bf16.mxu0 %v873_v17  ;;  %v877_v30 = vpack.c.bf16 %v153_v28, %v151_v27  ;;  %v24_v31 = vld [vmem:[%s1916_s0 + $0x50] sm:$0xff]  ;;  %v150_v32 = vld [vmem:[%s1916_s0 + $0x440] sm:$0xff]  ;;  %v27_v35 = vld [vmem:[%s1916_s0 + $0x68] sm:$0xff] }
   0x9   :  { %v152_v33 = vld [vmem:[%s1916_s0 + $0x450] sm:$0xff]  ;;  %748 = vmatpush1.bf16.msra.mxu1 %v747_v21  ;;  %v751_v34 = vpack.c.bf16 %v24_v31, %v22_v29  ;;  %v29_v36 = vld [vmem:[%s1916_s0 + $0x78] sm:$0xff]  ;;  %v155_v37 = vld [vmem:[%s1916_s0 + $0x468] sm:$0xff] }
   0xa   :  { %876 = vmatpush1.bf16.msra.mxu0 %v875_v25  ;;  %750 = vmatprep.subr.bf16.mxu1 %v749_v26  ;;  %v879_v38 = vpack.c.bf16 %v152_v33, %v150_v32  ;;  %v753_v39 = vpack.c.bf16 %v29_v36, %v27_v35  ;;  %v157_v40 = vld [vmem:[%s1916_s0 + $0x478] sm:$0xff]  ;;  %v26_v41 = vld [vmem:[%s1916_s0 + $0x60] sm:$0xff]  ;;  %v28_v42 = vld [vmem:[%s1916_s0 + $0x70] sm:$0xff] }
   0xb   :  { %878 = vmatprep.subr.bf16.mxu0 %v877_v30  ;;  %v881_v43 = vpack.c.bf16 %v157_v40, %v155_v37  ;;  %v154_v44 = vld [vmem:[%s1916_s0 + $0x460] sm:$0xff]  ;;  %v156_v45 = vld [vmem:[%s1916_s0 + $0x470] sm:$0xff]  ;;  %v31_v46 = vld [vmem:[%s1916_s0 + $0x88] sm:$0xff]  ;;  %v755_v50 = vpack.c.bf16 %v28_v42, %v26_v41 }
   0xc   :  { %v33_v47 = vld [vmem:[%s1916_s0 + $0x98] sm:$0xff]  ;;  %v159_v48 = vld [vmem:[%s1916_s0 + $0x488] sm:$0xff]  ;;  %v883_v51 = vpack.c.bf16 %v156_v45, %v154_v44  ;;  %v30_v53 = vld [vmem:[%s1916_s0 + $0x80] sm:$0xff] }
   0xd   :  { %v161_v49 = vld [vmem:[%s1916_s0 + $0x498] sm:$0xff]  ;;  %752 = vmatpush1.bf16.msra.mxu1 %v751_v34  ;;  %v757_v52 = vpack.c.bf16 %v33_v47, %v31_v46  ;;  %v32_v54 = vld [vmem:[%s1916_s0 + $0x90] sm:$0xff]  ;;  %v158_v55 = vld [vmem:[%s1916_s0 + $0x480] sm:$0xff] }
   0xe   :  { %880 = vmatpush1.bf16.msra.mxu0 %v879_v38  ;;  %754 = vmatprep.subr.bf16.mxu1 %v753_v39  ;;  %v885_v56 = vpack.c.bf16 %v161_v49, %v159_v48  ;;  %v160_v57 = vld [vmem:[%s1916_s0 + $0x490] sm:$0xff]  ;;  %v35_v58 = vld [vmem:[%s1916_s0 + $0xa8] sm:$0xff]  ;;  %v37_v59 = vld [vmem:[%s1916_s0 + $0xb8] sm:$0xff]  ;;  %v759_v62 = vpack.c.bf16 %v32_v54, %v30_v53 }
   0xf   :  { %882 = vmatprep.subr.bf16.mxu0 %v881_v43  ;;  %v163_v60 = vld [vmem:[%s1916_s0 + $0x4a8] sm:$0xff]  ;;  %v165_v61 = vld [vmem:[%s1916_s0 + $0x4b8] sm:$0xff]  ;;  %v887_v63 = vpack.c.bf16 %v160_v57, %v158_v55  ;;  %v761_v0 = vpack.c.bf16 %v37_v59, %v35_v58  ;;  %v34_v1 = vld [vmem:[%s1916_s0 + $0xa0] sm:$0xff] }
  0x10   :  { %v36_v2 = vld [vmem:[%s1916_s0 + $0xb0] sm:$0xff]  ;;  %v162_v3 = vld [vmem:[%s1916_s0 + $0x4a0] sm:$0xff]  ;;  %v889_v4 = vpack.c.bf16 %v165_v61, %v163_v60  ;;  %v39_v6 = vld [vmem:[%s1916_s0 + $0xc8] sm:$0xff] }
  0x11   :  { %756 = vmatpush1.bf16.msra.mxu1 %v755_v50  ;;  %v164_v5 = vld [vmem:[%s1916_s0 + $0x4b0] sm:$0xff]  ;;  %v41_v7 = vld [vmem:[%s1916_s0 + $0xd8] sm:$0xff]  ;;  %v167_v8 = vld [vmem:[%s1916_s0 + $0x4c8] sm:$0xff]  ;;  %v763_v10 = vpack.c.bf16 %v36_v2, %v34_v1 }
  0x12   :  { %884 = vmatpush1.bf16.msra.mxu0 %v883_v51  ;;  %758 = vmatprep.subr.bf16.mxu1 %v757_v52  ;;  %v169_v9 = vld [vmem:[%s1916_s0 + $0x4d8] sm:$0xff]  ;;  %v891_v11 = vpack.c.bf16 %v164_v5, %v162_v3  ;;  %v765_v12 = vpack.c.bf16 %v41_v7, %v39_v6  ;;  %v38_v13 = vld [vmem:[%s1916_s0 + $0xc0] sm:$0xff]  ;;  %v40_v14 = vld [vmem:[%s1916_s0 + $0xd0] sm:$0xff] }
  0x13   :  { %886 = vmatprep.subr.bf16.mxu0 %v885_v56  ;;  %v166_v15 = vld [vmem:[%s1916_s0 + $0x4c0] sm:$0xff]  ;;  %v893_v16 = vpack.c.bf16 %v169_v9, %v167_v8  ;;  %v168_v17 = vld [vmem:[%s1916_s0 + $0x4d0] sm:$0xff]  ;;  %v43_v18 = vld [vmem:[%s1916_s0 + $0xe8] sm:$0xff]  ;;  %v767_v22 = vpack.c.bf16 %v40_v14, %v38_v13 }
  0x14   :  { %v45_v19 = vld [vmem:[%s1916_s0 + $0xf8] sm:$0xff]  ;;  %v171_v20 = vld [vmem:[%s1916_s0 + $0x4e8] sm:$0xff]  ;;  %v895_v23 = vpack.c.bf16 %v168_v17, %v166_v15  ;;  %v42_v25 = vld [vmem:[%s1916_s0 + $0xe0] sm:$0xff] }
  0x15   :  { %760 = vmatpush1.bf16.msra.mxu1 %v759_v62  ;;  %v173_v21 = vld [vmem:[%s1916_s0 + $0x4f8] sm:$0xff]  ;;  %v769_v24 = vpack.c.bf16 %v45_v19, %v43_v18  ;;  %v44_v26 = vld [vmem:[%s1916_s0 + $0xf0] sm:$0xff]  ;;  %v170_v27 = vld [vmem:[%s1916_s0 + $0x4e0] sm:$0xff] }
  0x16   :  { %888 = vmatpush1.bf16.msra.mxu0 %v887_v63  ;;  %762 = vmatprep.subr.bf16.mxu1 %v761_v0  ;;  %v897_v28 = vpack.c.bf16 %v173_v21, %v171_v20  ;;  %v172_v29 = vld [vmem:[%s1916_s0 + $0x4f0] sm:$0xff]  ;;  %v47_v30 = vld [vmem:[%s1916_s0 + $0x108] sm:$0xff]  ;;  %v49_v31 = vld [vmem:[%s1916_s0 + $0x118] sm:$0xff]  ;;  %v771_v34 = vpack.c.bf16 %v44_v26, %v42_v25 }
  0x17   :  { %890 = vmatprep.subr.bf16.mxu0 %v889_v4  ;;  %v175_v32 = vld [vmem:[%s1916_s0 + $0x508] sm:$0xff]  ;;  %v177_v33 = vld [vmem:[%s1916_s0 + $0x518] sm:$0xff]  ;;  %v899_v35 = vpack.c.bf16 %v172_v29, %v170_v27  ;;  %v773_v36 = vpack.c.bf16 %v49_v31, %v47_v30  ;;  %v46_v37 = vld [vmem:[%s1916_s0 + $0x100] sm:$0xff] }
  0x18   :  { %v48_v38 = vld [vmem:[%s1916_s0 + $0x110] sm:$0xff]  ;;  %v174_v39 = vld [vmem:[%s1916_s0 + $0x500] sm:$0xff]  ;;  %v901_v40 = vpack.c.bf16 %v177_v33, %v175_v32  ;;  %v51_v42 = vld [vmem:[%s1916_s0 + $0x128] sm:$0xff] }
  0x19   :  { %764 = vmatpush1.bf16.msra.mxu1 %v763_v10  ;;  %v176_v41 = vld [vmem:[%s1916_s0 + $0x510] sm:$0xff]  ;;  %v53_v43 = vld [vmem:[%s1916_s0 + $0x138] sm:$0xff]  ;;  %v179_v44 = vld [vmem:[%s1916_s0 + $0x528] sm:$0xff]  ;;  %v775_v46 = vpack.c.bf16 %v48_v38, %v46_v37 }
  0x1a   :  { %892 = vmatpush1.bf16.msra.mxu0 %v891_v11  ;;  %766 = vmatprep.subr.bf16.mxu1 %v765_v12  ;;  %v181_v45 = vld [vmem:[%s1916_s0 + $0x538] sm:$0xff]  ;;  %v903_v47 = vpack.c.bf16 %v176_v41, %v174_v39  ;;  %v777_v48 = vpack.c.bf16 %v53_v43, %v51_v42  ;;  %v50_v49 = vld [vmem:[%s1916_s0 + $0x120] sm:$0xff]  ;;  %v52_v50 = vld [vmem:[%s1916_s0 + $0x130] sm:$0xff] }
  0x1b   :  { %894 = vmatprep.subr.bf16.mxu0 %v893_v16  ;;  %v178_v51 = vld [vmem:[%s1916_s0 + $0x520] sm:$0xff]  ;;  %v905_v52 = vpack.c.bf16 %v181_v45, %v179_v44  ;;  %v180_v53 = vld [vmem:[%s1916_s0 + $0x530] sm:$0xff]  ;;  %v55_v54 = vld [vmem:[%s1916_s0 + $0x148] sm:$0xff]  ;;  %v779_v58 = vpack.c.bf16 %v52_v50, %v50_v49 }
  0x1c   :  { %v57_v55 = vld [vmem:[%s1916_s0 + $0x158] sm:$0xff]  ;;  %v183_v56 = vld [vmem:[%s1916_s0 + $0x548] sm:$0xff]  ;;  %v907_v59 = vpack.c.bf16 %v180_v53, %v178_v51  ;;  %v54_v61 = vld [vmem:[%s1916_s0 + $0x140] sm:$0xff] }
  0x1d   :  { %768 = vmatpush1.bf16.msra.mxu1 %v767_v22  ;;  %v185_v57 = vld [vmem:[%s1916_s0 + $0x558] sm:$0xff]  ;;  %v781_v60 = vpack.c.bf16 %v57_v55, %v55_v54  ;;  %v56_v62 = vld [vmem:[%s1916_s0 + $0x150] sm:$0xff]  ;;  %v182_v63 = vld [vmem:[%s1916_s0 + $0x540] sm:$0xff] }
  0x1e   :  { %896 = vmatpush1.bf16.msra.mxu0 %v895_v23  ;;  %770 = vmatprep.subr.bf16.mxu1 %v769_v24  ;;  %v909_v0 = vpack.c.bf16 %v185_v57, %v183_v56  ;;  %v184_v1 = vld [vmem:[%s1916_s0 + $0x550] sm:$0xff]  ;;  %v59_v2 = vld [vmem:[%s1916_s0 + $0x168] sm:$0xff]  ;;  %v61_v3 = vld [vmem:[%s1916_s0 + $0x178] sm:$0xff]  ;;  %v783_v6 = vpack.c.bf16 %v56_v62, %v54_v61 }
  0x1f   :  { %898 = vmatprep.subr.bf16.mxu0 %v897_v28  ;;  %v187_v4 = vld [vmem:[%s1916_s0 + $0x568] sm:$0xff]  ;;  %v189_v5 = vld [vmem:[%s1916_s0 + $0x578] sm:$0xff]  ;;  %v58_v7 = vld [vmem:[%s1916_s0 + $0x160] sm:$0xff]  ;;  %v911_v8 = vpack.c.bf16 %v184_v1, %v182_v63  ;;  %v785_v9 = vpack.c.bf16 %v61_v3, %v59_v2 }
  0x20   :  { %v60_v10 = vld [vmem:[%s1916_s0 + $0x170] sm:$0xff]  ;;  %v186_v11 = vld [vmem:[%s1916_s0 + $0x560] sm:$0xff]  ;;  %v913_v13 = vpack.c.bf16 %v189_v5, %v187_v4  ;;  %v63_v14 = vld [vmem:[%s1916_s0 + $0x188] sm:$0xff] }
  0x21   :  { %772 = vmatpush1.bf16.msra.mxu1 %v771_v34  ;;  %v188_v12 = vld [vmem:[%s1916_s0 + $0x570] sm:$0xff]  ;;  %v65_v15 = vld [vmem:[%s1916_s0 + $0x198] sm:$0xff]  ;;  %v255_v16 = vld [vmem:[%s1917_s1 + $0x8] sm:$0xff]  ;;  %v787_v20 = vpack.c.bf16 %v60_v10, %v58_v7 }
  0x22   :  { %900 = vmatpush1.bf16.msra.mxu0 %v899_v35  ;;  %774 = vmatprep.subr.bf16.mxu1 %v773_v36  ;;  %v191_v17 = vld [vmem:[%s1916_s0 + $0x588] sm:$0xff]  ;;  %v193_v18 = vld [vmem:[%s1916_s0 + $0x598] sm:$0xff]  ;;  %v915_v21 = vpack.c.bf16 %v188_v12, %v186_v11  ;;  %v789_v22 = vpack.c.bf16 %v65_v15, %v63_v14  ;;  %v62_v23 = vld [vmem:[%s1916_s0 + $0x180] sm:$0xff] }
  0x23   :  { %902 = vmatprep.subr.bf16.mxu0 %v901_v40  ;;  %374 = vmatprep.mubr.f32.mxu1 %v255_v16  ;;  %v259_v19 = vld [vmem:[%s1917_s1 + $0x28] sm:$0xff]  ;;  %v64_v24 = vld [vmem:[%s1916_s0 + $0x190] sm:$0xff]  ;;  %v190_v25 = vld [vmem:[%s1916_s0 + $0x580] sm:$0xff]  ;;  %v917_v26 = vpack.c.bf16 %v193_v18, %v191_v17 }
  0x24   :  { %564 = vmatprep.mubr.f32.mxu0 %v259_v19  ;;  %v192_v27 = vld [vmem:[%s1916_s0 + $0x590] sm:$0xff]  ;;  %v67_v28 = vld [vmem:[%s1916_s0 + $0x1a8] sm:$0xff]  ;;  %v69_v29 = vld [vmem:[%s1916_s0 + $0x1b8] sm:$0xff]  ;;  %v791_v32 = vpack.c.bf16 %v64_v24, %v62_v23 }
  0x25   :  { %776 = vmatpush1.bf16.msra.mxu1 %v775_v46  ;;  %v195_v30 = vld [vmem:[%s1916_s0 + $0x5a8] sm:$0xff]  ;;  %v197_v31 = vld [vmem:[%s1916_s0 + $0x5b8] sm:$0xff]  ;;  %v919_v33 = vpack.c.bf16 %v192_v27, %v190_v25  ;;  %v793_v34 = vpack.c.bf16 %v69_v29, %v67_v28  ;;  %v66_v35 = vld [vmem:[%s1916_s0 + $0x1a0] sm:$0xff] }
  0x26   :  { %904 = vmatpush1.bf16.msra.mxu0 %v903_v47  ;;  %778 = vmatprep.subr.bf16.mxu1 %v777_v48  ;;  %v68_v36 = vld [vmem:[%s1916_s0 + $0x1b0] sm:$0xff]  ;;  %v194_v37 = vld [vmem:[%s1916_s0 + $0x5a0] sm:$0xff]  ;;  %v921_v38 = vpack.c.bf16 %v197_v31, %v195_v30  ;;  %v71_v40 = vld [vmem:[%s1916_s0 + $0x1c8] sm:$0xff] }
  0x27   :  { %906 = vmatprep.subr.bf16.mxu0 %v905_v52  ;;  %v196_v39 = vld [vmem:[%s1916_s0 + $0x5b0] sm:$0xff]  ;;  %v73_v41 = vld [vmem:[%s1916_s0 + $0x1d8] sm:$0xff]  ;;  %v199_v42 = vld [vmem:[%s1916_s0 + $0x5c8] sm:$0xff]  ;;  %v795_v44 = vpack.c.bf16 %v68_v36, %v66_v35 }
  0x28   :  { %v201_v43 = vld [vmem:[%s1916_s0 + $0x5d8] sm:$0xff]  ;;  %v923_v45 = vpack.c.bf16 %v196_v39, %v194_v37  ;;  %v797_v46 = vpack.c.bf16 %v73_v41, %v71_v40  ;;  %v70_v47 = vld [vmem:[%s1916_s0 + $0x1c0] sm:$0xff]  ;;  %v72_v48 = vld [vmem:[%s1916_s0 + $0x1d0] sm:$0xff] }
  0x29   :  { %780 = vmatpush1.bf16.msra.mxu1 %v779_v58  ;;  %v198_v49 = vld [vmem:[%s1916_s0 + $0x5c0] sm:$0xff]  ;;  %v925_v50 = vpack.c.bf16 %v201_v43, %v199_v42  ;;  %v200_v51 = vld [vmem:[%s1916_s0 + $0x5d0] sm:$0xff]  ;;  %v75_v52 = vld [vmem:[%s1916_s0 + $0x1e8] sm:$0xff]  ;;  %v799_v56 = vpack.c.bf16 %v72_v48, %v70_v47 }
  0x2a   :  { %908 = vmatpush1.bf16.msra.mxu0 %v907_v59  ;;  %782 = vmatprep.subr.bf16.mxu1 %v781_v60  ;;  %v77_v53 = vld [vmem:[%s1916_s0 + $0x1f8] sm:$0xff]  ;;  %v203_v54 = vld [vmem:[%s1916_s0 + $0x5e8] sm:$0xff]  ;;  %v927_v57 = vpack.c.bf16 %v200_v51, %v198_v49  ;;  %v74_v59 = vld [vmem:[%s1916_s0 + $0x1e0] sm:$0xff] }
  0x2b   :  { %910 = vmatprep.subr.bf16.mxu0 %v909_v0  ;;  %v205_v55 = vld [vmem:[%s1916_s0 + $0x5f8] sm:$0xff]  ;;  %v801_v58 = vpack.c.bf16 %v77_v53, %v75_v52  ;;  %v76_v60 = vld [vmem:[%s1916_s0 + $0x1f0] sm:$0xff]  ;;  %v202_v61 = vld [vmem:[%s1916_s0 + $0x5e0] sm:$0xff] }
  0x2c   :  { %v929_v62 = vpack.c.bf16 %v205_v55, %v203_v54  ;;  %v204_v63 = vld [vmem:[%s1916_s0 + $0x5f0] sm:$0xff]  ;;  %v79_v0 = vld [vmem:[%s1916_s0 + $0x208] sm:$0xff]  ;;  %v81_v1 = vld [vmem:[%s1916_s0 + $0x218] sm:$0xff]  ;;  %v803_v4 = vpack.c.bf16 %v76_v60, %v74_v59 }
  0x2d   :  { %784 = vmatpush1.bf16.msra.mxu1 %v783_v6  ;;  %v207_v2 = vld [vmem:[%s1916_s0 + $0x608] sm:$0xff]  ;;  %v209_v3 = vld [vmem:[%s1916_s0 + $0x618] sm:$0xff]  ;;  %v931_v5 = vpack.c.bf16 %v204_v63, %v202_v61  ;;  %v805_v6 = vpack.c.bf16 %v81_v1, %v79_v0  ;;  %v78_v7 = vld [vmem:[%s1916_s0 + $0x200] sm:$0xff] }
  0x2e   :  { %912 = vmatpush1.bf16.msra.mxu0 %v911_v8  ;;  %786 = vmatprep.subr.bf16.mxu1 %v785_v9  ;;  %v80_v8 = vld [vmem:[%s1916_s0 + $0x210] sm:$0xff]  ;;  %v206_v9 = vld [vmem:[%s1916_s0 + $0x600] sm:$0xff]  ;;  %v933_v10 = vpack.c.bf16 %v209_v3, %v207_v2  ;;  %v83_v12 = vld [vmem:[%s1916_s0 + $0x228] sm:$0xff] }
  0x2f   :  { %914 = vmatprep.subr.bf16.mxu0 %v913_v13  ;;  %v208_v11 = vld [vmem:[%s1916_s0 + $0x610] sm:$0xff]  ;;  %v85_v13 = vld [vmem:[%s1916_s0 + $0x238] sm:$0xff]  ;;  %v211_v14 = vld [vmem:[%s1916_s0 + $0x628] sm:$0xff]  ;;  %v807_v17 = vpack.c.bf16 %v80_v8, %v78_v7 }
  0x30   :  { %v213_v15 = vld [vmem:[%s1916_s0 + $0x638] sm:$0xff]  ;;  %v254_v16 = vld [vmem:[%s1917_s1] sm:$0xff]  ;;  %v935_v19 = vpack.c.bf16 %v208_v11, %v206_v9  ;;  %v212_v25 = vld [vmem:[%s1916_s0 + $0x630] sm:$0xff] }
  0x31   :  { %788 = vmatpush1.bf16.msra.mxu1 %v787_v20  ;;  %v258_v18 = vld [vmem:[%s1917_s1 + $0x20] sm:$0xff]  ;;  %v809_v20 = vpack.c.bf16 %v85_v13, %v83_v12  ;;  %v937_v24 = vpack.c.bf16 %v213_v15, %v211_v14  ;;  %v89_v27 = vld [vmem:[%s1916_s0 + $0x258] sm:$0xff]  ;;  %v215_v28 = vld [vmem:[%s1916_s0 + $0x648] sm:$0xff] }
  0x32   :  { %916 = vmatpush1.bf16.msra.mxu0 %v915_v21  ;;  %790 = vmatprep.subr.bf16.mxu1 %v789_v22  ;;  %v82_v21 = vld [vmem:[%s1916_s0 + $0x220] sm:$0xff]  ;;  %v84_v22 = vld [vmem:[%s1916_s0 + $0x230] sm:$0xff]  ;;  %v217_v29 = vld [vmem:[%s1916_s0 + $0x658] sm:$0xff] }
  0x33   :  { %918 = vmatprep.subr.bf16.mxu0 %v917_v26  ;;  %v210_v23 = vld [vmem:[%s1916_s0 + $0x620] sm:$0xff]  ;;  %v87_v26 = vld [vmem:[%s1916_s0 + $0x248] sm:$0xff]  ;;  %v811_v31 = vpack.c.bf16 %v84_v22, %v82_v21  ;;  %v88_v35 = vld [vmem:[%s1916_s0 + $0x250] sm:$0xff] }
  0x34   :  { %v267_v30 = vld [vmem:[%s1917_s1 + $0x68] sm:$0xff]  ;;  %v214_v36 = vld [vmem:[%s1916_s0 + $0x640] sm:$0xff]  ;;  %v216_v39 = vld [vmem:[%s1916_s0 + $0x650] sm:$0xff] }
  0x35   :  { %792 = vmatpush1.bf16.msra.mxu1 %v791_v32  ;;  %v86_v32 = vld [vmem:[%s1916_s0 + $0x240] sm:$0xff]  ;;  %v91_v40 = vld [vmem:[%s1916_s0 + $0x268] sm:$0xff]  ;;  %v93_v41 = vld [vmem:[%s1916_s0 + $0x278] sm:$0xff]  ;;  %v943_v47 = vpack.c.bf16 %v216_v39, %v214_v36 }
  0x36   :  { %920 = vmatpush1.bf16.msra.mxu0 %v919_v33  ;;  %794 = vmatprep.subr.bf16.mxu1 %v793_v34  ;;  %v939_v33 = vpack.c.bf16 %v212_v25, %v210_v23  ;;  %v813_v34 = vpack.c.bf16 %v89_v27, %v87_v26  ;;  %v266_v37 = vld [vmem:[%s1917_s1 + $0x60] sm:$0xff]  ;;  %v219_v42 = vld [vmem:[%s1916_s0 + $0x668] sm:$0xff]  ;;  %v221_v43 = vld [vmem:[%s1916_s0 + $0x678] sm:$0xff]  ;;  %v817_v48 = vpack.c.bf16 %v93_v41, %v91_v40 }
  0x37   :  { %922 = vmatprep.subr.bf16.mxu0 %v921_v38  ;;  %v941_v38 = vpack.c.bf16 %v217_v29, %v215_v28  ;;  %v92_v49 = vld [vmem:[%s1916_s0 + $0x270] sm:$0xff]  ;;  %v274_v51 = vld [vmem:[%s1917_s1 + $0xa0] sm:$0xff]  ;;  %v945_v52 = vpack.c.bf16 %v221_v43, %v219_v42  ;;  %v95_v54 = vld [vmem:[%s1916_s0 + $0x288] sm:$0xff] }
  0x38   :  { %v220_v53 = vld [vmem:[%s1916_s0 + $0x670] sm:$0xff]  ;;  %v97_v55 = vld [vmem:[%s1916_s0 + $0x298] sm:$0xff]  ;;  %v94_v60 = vld [vmem:[%s1916_s0 + $0x280] sm:$0xff] }
  0x39   :  { %796 = vmatpush1.bf16.msra.mxu1 %v795_v44  ;;  %v275_v44 = vld [vmem:[%s1917_s1 + $0xa8] sm:$0xff]  ;;  %v96_v61 = vld [vmem:[%s1916_s0 + $0x290] sm:$0xff]  ;;  %v821_v63 = vpack.c.bf16 %v97_v55, %v95_v54  ;;  %v222_v0 = vld [vmem:[%s1916_s0 + $0x680] sm:$0xff] }
  0x3a   :  { %924 = vmatpush1.bf16.msra.mxu0 %v923_v45  ;;  %798 = vmatprep.subr.bf16.mxu1 %v797_v46  ;;  %v815_v45 = vpack.c.bf16 %v88_v35, %v86_v32  ;;  %v90_v46 = vld [vmem:[%s1916_s0 + $0x260] sm:$0xff]  ;;  %v224_v1 = vld [vmem:[%s1916_s0 + $0x690] sm:$0xff]  ;;  %v227_v7 = vld [vmem:[%s1916_s0 + $0x6a8] sm:$0xff] }
  0x3b   :  { %926 = vmatprep.subr.bf16.mxu0 %v925_v50  ;;  %v218_v50 = vld [vmem:[%s1916_s0 + $0x660] sm:$0xff]  ;;  %v819_v59 = vpack.c.bf16 %v92_v49, %v90_v46  ;;  %v229_v8 = vld [vmem:[%s1916_s0 + $0x6b8] sm:$0xff]  ;;  %v291_v9 = vld [vmem:[%s1917_s1 + $0x128] sm:$0xff]  ;;  %v951_v13 = vpack.c.bf16 %v224_v1, %v222_v0 }
  0x3c   :  { %v282_v2 = vld [vmem:[%s1917_s1 + $0xe0] sm:$0xff]  ;;  %v100_v15 = vld [vmem:[%s1916_s0 + $0x2b0] sm:$0xff]  ;;  %v105_v21 = vld [vmem:[%s1916_s0 + $0x2d8] sm:$0xff] }
  0x3d   :  { %800 = vmatpush1.bf16.msra.mxu1 %v799_v56  ;;  %v223_v56 = vld [vmem:[%s1916_s0 + $0x688] sm:$0xff]  ;;  %v98_v11 = vld [vmem:[%s1916_s0 + $0x2a0] sm:$0xff]  ;;  %v233_v23 = vld [vmem:[%s1916_s0 + $0x6d8] sm:$0xff] }
  0x3e   :  { %928 = vmatpush1.bf16.msra.mxu0 %v927_v57  ;;  %802 = vmatprep.subr.bf16.mxu1 %v801_v58  ;;  %v225_v57 = vld [vmem:[%s1916_s0 + $0x698] sm:$0xff]  ;;  %v283_v58 = vld [vmem:[%s1917_s1 + $0xe8] sm:$0xff]  ;;  %v262_v12 = vld [vmem:[%s1917_s1 + $0x40] sm:$0xff]  ;;  %v827_v25 = vpack.c.bf16 %v100_v15, %v98_v11 }
  0x3f   :  { %930 = vmatprep.subr.bf16.mxu0 %v929_v62  ;;  %v947_v62 = vpack.c.bf16 %v220_v53, %v218_v50  ;;  %v949_v3 = vpack.c.bf16 %v225_v57, %v223_v56  ;;  %v231_v22 = vld [vmem:[%s1916_s0 + $0x6c8] sm:$0xff]  ;;  %v102_v29 = vld [vmem:[%s1916_s0 + $0x2c0] sm:$0xff]  ;;  %v109_v35 = vld [vmem:[%s1916_s0 + $0x2f8] sm:$0xff] }
  0x40   :  { %v271_v26 = vld [vmem:[%s1917_s1 + $0x88] sm:$0xff]  ;;  %v957_v32 = vpack.c.bf16 %v233_v23, %v231_v22  ;;  %v106_v43 = vld [vmem:[%s1916_s0 + $0x2e0] sm:$0xff]  ;;  %v113_v49 = vld [vmem:[%s1916_s0 + $0x318] sm:$0xff] }
  0x41   :  { %804 = vmatpush1.bf16.msra.mxu1 %v803_v4  ;;  %v99_v4 = vld [vmem:[%s1916_s0 + $0x2a8] sm:$0xff]  ;;  %v110_v57 = vld [vmem:[%s1916_s0 + $0x300] sm:$0xff]  ;;  %v245_v1 = vld [vmem:[%s1916_s0 + $0x738] sm:$0xff] }
  0x42   :  { %932 = vmatpush1.bf16.msra.mxu0 %v931_v5  ;;  %806 = vmatprep.subr.bf16.mxu1 %v805_v6  ;;  %v101_v5 = vld [vmem:[%s1916_s0 + $0x2b8] sm:$0xff]  ;;  %v263_v6 = vld [vmem:[%s1917_s1 + $0x48] sm:$0xff]  ;;  %v244_v11 = vld [vmem:[%s1916_s0 + $0x730] sm:$0xff] }
  0x43   :  { %934 = vmatprep.subr.bf16.mxu0 %v933_v10  ;;  %v823_v10 = vpack.c.bf16 %v96_v61, %v94_v60  ;;  %v825_v14 = vpack.c.bf16 %v101_v5, %v99_v4  ;;  %v235_v36 = vld [vmem:[%s1916_s0 + $0x6e8] sm:$0xff]  ;;  %v240_v61 = vld [vmem:[%s1916_s0 + $0x710] sm:$0xff]  ;;  %v257_v4 = vld [vmem:[%s1917_s1 + $0x18] sm:$0xff] }
  0x44   :  { %375 = vmatmul.mubr.f32.vlgmr.msra.gmra.mrb[0].mxu1 %v254_v16  ;;  %v226_v16 = vld [vmem:[%s1916_s0 + $0x6a0] sm:$0xff]  ;;  %v279_v40 = vld [vmem:[%s1917_s1 + $0xc8] sm:$0xff]  ;;  %v249_v15 = vld [vmem:[%s1916_s0 + $0x758] sm:$0xff] }
  0x45   :  { %808 = vmatpush1.bf16.msra.mxu1 %v807_v17  ;;  %565 = vmatmul.mubr.f32.vlgmr.msra.gmra.mrb[0].mxu0 %v258_v18  ;;  %v290_v17 = vld [vmem:[%s1917_s1 + $0x120] sm:$0xff]  ;;  %v953_v18 = vpack.c.bf16 %v229_v8, %v227_v7  ;;  %v239_v50 = vld [vmem:[%s1916_s0 + $0x708] sm:$0xff]  ;;  %v116_v8 = vld [vmem:[%s1916_s0 + $0x330] sm:$0xff] }
  0x46   :  { %936 = vmatpush1.bf16.msra.mxu0 %v935_v19  ;;  %810 = vmatprep.subr.bf16.mxu1 %v809_v20  ;;  %v228_v19 = vld [vmem:[%s1916_s0 + $0x6b0] sm:$0xff]  ;;  %v103_v20 = vld [vmem:[%s1916_s0 + $0x2c8] sm:$0xff]  ;;  %v114_v7 = vld [vmem:[%s1916_s0 + $0x320] sm:$0xff] }
  0x47   :  { %938 = vmatprep.subr.bf16.mxu0 %v937_v24  ;;  %570 = vmatprep.mubr.f32.mxu0 %v267_v30  ;;  %v261_v24 = vld [vmem:[%s1917_s1 + $0x38] sm:$0xff]  ;;  %v955_v27 = vpack.c.bf16 %v228_v19, %v226_v16  ;;  %v829_v28 = vpack.c.bf16 %v105_v21, %v103_v20  ;;  %v104_v30 = vld [vmem:[%s1916_s0 + $0x2d0] sm:$0xff]  ;;  %v287_v54 = vld [vmem:[%s1917_s1 + $0x108] sm:$0xff]  ;;  %v843_v16 = vpack.c.bf16 %v116_v8, %v114_v7 }
  0x48   :  { %380 = vmatprep.mubr.f32.mxu1 %v263_v6  ;;  %v831_v39 = vpack.c.bf16 %v104_v30, %v102_v29  ;;  %v243_v0 = vld [vmem:[%s1916_s0 + $0x728] sm:$0xff]  ;;  %v118_v19 = vld [vmem:[%s1916_s0 + $0x340] sm:$0xff]  ;;  %v120_v20 = vld [vmem:[%s1916_s0 + $0x350] sm:$0xff] }
  0x49   :  { %812 = vmatpush1.bf16.msra.mxu1 %v811_v31  ;;  %571 = vmatmul.mubr.f32.gmra.mrb[2].mxu0 %v266_v37  ;;  %v230_v31 = vld [vmem:[%s1916_s0 + $0x6c0] sm:$0xff]  ;;  %v237_v37 = vld [vmem:[%s1916_s0 + $0x6f8] sm:$0xff]  ;;  %v248_v23 = vld [vmem:[%s1916_s0 + $0x750] sm:$0xff] }
  0x4a   :  { %940 = vmatpush1.bf16.msra.mxu0 %v939_v33  ;;  %814 = vmatprep.subr.bf16.mxu1 %v813_v34  ;;  %v232_v33 = vld [vmem:[%s1916_s0 + $0x6d0] sm:$0xff]  ;;  %v107_v34 = vld [vmem:[%s1916_s0 + $0x2e8] sm:$0xff]  ;;  %v961_v46 = vpack.c.bf16 %v237_v37, %v235_v36  ;;  %v246_v21 = vld [vmem:[%s1916_s0 + $0x740] sm:$0xff] }
  0x4b   :  { %942 = vmatprep.subr.bf16.mxu0 %v941_v38  ;;  %576 = vmatprep.mubr.f32.mxu0 %v275_v44  ;;  %v270_v38 = vld [vmem:[%s1917_s1 + $0x80] sm:$0xff]  ;;  %v959_v41 = vpack.c.bf16 %v232_v33, %v230_v31  ;;  %v833_v42 = vpack.c.bf16 %v109_v35, %v107_v34  ;;  %v108_v44 = vld [vmem:[%s1916_s0 + $0x2f0] sm:$0xff]  ;;  %v975_v29 = vpack.c.bf16 %v248_v23, %v246_v21  ;;  %v127_v36 = vld [vmem:[%s1916_s0 + $0x388] sm:$0xff] }
  0x4c   :  { %381 = vmatmul.mubr.f32.gmra.mrb[2].mxu1 %v262_v12  ;;  %v835_v53 = vpack.c.bf16 %v108_v44, %v106_v43  ;;  %v119_v12 = vld [vmem:[%s1916_s0 + $0x348] sm:$0xff]  ;;  %v122_v31 = vld [vmem:[%s1916_s0 + $0x360] sm:$0xff]  ;;  %v252_v35 = vld [vmem:[%s1916_s0 + $0x770] sm:$0xff] }
  0x4d   :  { %816 = vmatpush1.bf16.msra.mxu1 %v815_v45  ;;  %577 = vmatmul.mubr.f32.gmra.mrb[4].mxu0 %v274_v51  ;;  %v234_v45 = vld [vmem:[%s1916_s0 + $0x6e0] sm:$0xff]  ;;  %v241_v51 = vld [vmem:[%s1916_s0 + $0x718] sm:$0xff]  ;;  %v131_v43 = vld [vmem:[%s1916_s0 + $0x3a8] sm:$0xff] }
  0x4e   :  { %944 = vmatpush1.bf16.msra.mxu0 %v943_v47  ;;  %818 = vmatprep.subr.bf16.mxu1 %v817_v48  ;;  %v236_v47 = vld [vmem:[%s1916_s0 + $0x6f0] sm:$0xff]  ;;  %v111_v48 = vld [vmem:[%s1916_s0 + $0x308] sm:$0xff]  ;;  %v965_v60 = vpack.c.bf16 %v241_v51, %v239_v50  ;;  %v250_v33 = vld [vmem:[%s1916_s0 + $0x760] sm:$0xff] }
  0x4f   :  { %946 = vmatprep.subr.bf16.mxu0 %v945_v52  ;;  %582 = vmatprep.mubr.f32.mxu0 %v283_v58  ;;  %v278_v52 = vld [vmem:[%s1917_s1 + $0xc0] sm:$0xff]  ;;  %v963_v55 = vpack.c.bf16 %v236_v47, %v234_v45  ;;  %v837_v56 = vpack.c.bf16 %v113_v49, %v111_v48  ;;  %v112_v58 = vld [vmem:[%s1916_s0 + $0x310] sm:$0xff]  ;;  %v129_v37 = vld [vmem:[%s1916_s0 + $0x398] sm:$0xff] }
  0x50   :  { %386 = vmatprep.mubr.f32.mxu1 %v271_v26  ;;  %v251_v26 = vld [vmem:[%s1916_s0 + $0x768] sm:$0xff]  ;;  %v133_v44 = vld [vmem:[%s1916_s0 + $0x3b8] sm:$0xff]  ;;  %v130_v48 = vld [vmem:[%s1916_s0 + $0x3a0] sm:$0xff] }
  0x51   :  { %820 = vmatpush1.bf16.msra.mxu1 %v819_v59  ;;  %583 = vmatmul.mubr.f32.gmra.mrb[6].mxu0 %v282_v2  ;;  %v238_v59 = vld [vmem:[%s1916_s0 + $0x700] sm:$0xff]  ;;  %v857_v47 = vpack.c.bf16 %v133_v44, %v131_v43  ;;  %v132_v49 = vld [vmem:[%s1916_s0 + $0x3b0] sm:$0xff]  ;;  %v269_v50 = vld [vmem:[%s1917_s1 + $0x78] sm:$0xff] }
  0x52   :  { %948 = vmatpush1.bf16.msra.mxu0 %v947_v62  ;;  %822 = vmatprep.subr.bf16.mxu1 %v821_v63  ;;  %v115_v62 = vld [vmem:[%s1916_s0 + $0x328] sm:$0xff]  ;;  %v117_v63 = vld [vmem:[%s1916_s0 + $0x338] sm:$0xff]  ;;  %v286_v2 = vld [vmem:[%s1917_s1 + $0x100] sm:$0xff]  ;;  %v967_v5 = vpack.c.bf16 %v240_v61, %v238_v59 }
  0x53   :  { %950 = vmatprep.subr.bf16.mxu0 %v949_v3  ;;  %588 = vmatprep.mubr.f32.mxu0 %v291_v9  ;;  %v839_v3 = vpack.c.bf16 %v112_v58, %v110_v57  ;;  %v841_v6 = vpack.c.bf16 %v117_v63, %v115_v62  ;;  %v242_v9 = vld [vmem:[%s1916_s0 + $0x720] sm:$0xff]  ;;  %v135_v51 = vld [vmem:[%s1916_s0 + $0x3c8] sm:$0xff]  ;;  %v136_v57 = vld [vmem:[%s1916_s0 + $0x3d0] sm:$0xff] }
  0x54   :  { %387 = vmatmul.mubr.f32.gmra.mrb[4].mxu1 %v270_v38  ;;  %v277_v58 = vld [vmem:[%s1917_s1 + $0xb8] sm:$0xff]  ;;  %v139_v59 = vld [vmem:[%s1916_s0 + $0x3e8] sm:$0xff]  ;;  %v276_v62 = vld [vmem:[%s1917_s1 + $0xb0] sm:$0xff] }
  0x55   :  { %824 = vmatpush1.bf16.msra.mxu1 %v823_v10  ;;  %589 = vmatmul.mubr.f32.gmra.mrb[8].mxu0 %v290_v17  ;;  %v969_v10 = vpack.c.bf16 %v245_v1, %v243_v0  ;;  %v971_v17 = vpack.c.bf16 %v244_v11, %v242_v9  ;;  %v138_v0 = vld [vmem:[%s1916_s0 + $0x3e0] sm:$0xff]  ;;  %v140_v1 = vld [vmem:[%s1916_s0 + $0x3f0] sm:$0xff]  ;;  %v265_v8 = vld [vmem:[%s1917_s1 + $0x58] sm:$0xff] }
  0x56   :  { %952 = vmatpush1.bf16.msra.mxu0 %v951_v13  ;;  %826 = vmatprep.subr.bf16.mxu1 %v825_v14  ;;  %v121_v13 = vld [vmem:[%s1916_s0 + $0x358] sm:$0xff]  ;;  %v247_v14 = vld [vmem:[%s1916_s0 + $0x748] sm:$0xff]  ;;  %v292_v7 = vld [vmem:[%s1917_s1 + $0x130] sm:$0xff] }
  0x57   :  { %954 = vmatprep.subr.bf16.mxu0 %v953_v18  ;;  %736 = vmatprep.mubr.msk.f32.mxu0 %vm294_vm0, %v261_v24  ;;  %v845_v18 = vpack.c.bf16 %v121_v13, %v119_v12  ;;  %v973_v22 = vpack.c.bf16 %v249_v15, %v247_v14  ;;  %v123_v24 = vld [vmem:[%s1916_s0 + $0x368] sm:$0xff]  ;;  %v264_v9 = vld [vmem:[%s1917_s1 + $0x50] sm:$0xff]  ;;  %v281_v12 = vld [vmem:[%s1917_s1 + $0xd8] sm:$0xff] }
  0x58   :  { %392 = vmatprep.mubr.f32.mxu1 %v279_v40  ;;  %v853_v40 = vpack.c.bf16 %v129_v37, %v127_v36  ;;  %v272_v11 = vld [vmem:[%s1917_s1 + $0x90] sm:$0xff]  ;;  %v289_v14 = vld [vmem:[%s1917_s1 + $0x118] sm:$0xff] }
  0x59   :  { %828 = vmatpush1.bf16.msra.mxu1 %v827_v25  ;;  %v125_v25 = vld [vmem:[%s1916_s0 + $0x378] sm:$0xff]  ;;  %v280_v13 = vld [vmem:[%s1917_s1 + $0xd0] sm:$0xff] }
  0x5a   :  { %956 = vmatpush1.bf16.msra.mxu0 %v955_v27  ;;  %830 = vmatprep.subr.bf16.mxu1 %v829_v28  ;;  %v253_v27 = vld [vmem:[%s1916_s0 + $0x778] sm:$0xff]  ;;  %v847_v28 = vpack.c.bf16 %v120_v20, %v118_v19  ;;  %v849_v30 = vpack.c.bf16 %v125_v25, %v123_v24  ;;  %v288_v15 = vld [vmem:[%s1917_s1 + $0x110] sm:$0xff] }
  0x5b   :  { %958 = vmatprep.subr.bf16.mxu0 %v957_v32  ;;  %393 = vmatmul.mubr.f32.gmra.mrb[6].mxu1 %v278_v52  ;;  %v124_v32 = vld [vmem:[%s1916_s0 + $0x370] sm:$0xff]  ;;  %v977_v34 = vpack.c.bf16 %v253_v27, %v251_v26  ;;  %v137_v52 = vld [vmem:[%s1916_s0 + $0x3d8] sm:$0xff] }
  0x5c   :  { %398 = vmatprep.mubr.f32.mxu1 %v287_v54  ;;  %v851_v38 = vpack.c.bf16 %v124_v32, %v122_v31  ;;  %v268_v54 = vld [vmem:[%s1917_s1 + $0x70] sm:$0xff] }
  0x5d   :  { %832 = vmatpush1.bf16.msra.mxu1 %v831_v39  ;;  %v979_v39 = vpack.c.bf16 %v252_v35, %v250_v33 }
  0x5e   :  { %960 = vmatpush1.bf16.msra.mxu0 %v959_v41  ;;  %834 = vmatprep.subr.bf16.mxu1 %v833_v42  ;;  %v126_v41 = vld [vmem:[%s1916_s0 + $0x380] sm:$0xff]  ;;  %v128_v42 = vld [vmem:[%s1916_s0 + $0x390] sm:$0xff] }
  0x5f   :  { %962 = vmatprep.subr.bf16.mxu0 %v961_v46  ;;  %399 = vmatmul.mubr.f32.gmra.mrb[8].mxu1 %v286_v2  ;;  %v855_v45 = vpack.c.bf16 %v128_v42, %v126_v41  ;;  %v260_v46 = vld [vmem:[%s1917_s1 + $0x30] sm:$0xff]  ;;  %v285_v2 = vld [vmem:[%s1917_s1 + $0xf8] sm:$0xff] }
  0x60   :  { %469 = vmatprep.mubr.f32.mxu1 %v257_v4  ;;  %v284_v4 = vld [vmem:[%s1917_s1 + $0xf0] sm:$0xff] }
  0x61   :  { %836 = vmatpush1.bf16.msra.mxu1 %v835_v53  ;;  %v859_v53 = vpack.c.bf16 %v132_v49, %v130_v48 }
  0x62   :  { %964 = vmatpush1.bf16.msra.mxu0 %v963_v55  ;;  %838 = vmatprep.subr.bf16.mxu1 %v837_v56  ;;  %v861_v55 = vpack.c.bf16 %v137_v52, %v135_v51  ;;  %v134_v56 = vld [vmem:[%s1916_s0 + $0x3c0] sm:$0xff] }
  0x63   :  { %966 = vmatprep.subr.bf16.mxu0 %v965_v60  ;;  %v141_v60 = vld [vmem:[%s1916_s0 + $0x3f8] sm:$0xff]  ;;  %v863_v61 = vpack.c.bf16 %v136_v57, %v134_v56  ;;  %v716_v56 = vld [vmem:[%s1918_s2] sm:$0xff] }
  0x64   :  { %v865_v63 = vpack.c.bf16 %v141_v60, %v139_v59  ;;  %v717_v60 = vld [vmem:[%s1918_s2 + $0x8] sm:$0xff] }
  0x65   :  { %840 = vmatpush1.bf16.msra.mxu1 %v839_v3  ;;  %v867_v3 = vpack.c.bf16 %v140_v1, %v138_v0  ;;  %v718_v0 = vld [vmem:[%s1918_s2 + $0x10] sm:$0xff] }
  0x66   :  { %968 = vmatpush1.bf16.msra.mxu0 %v967_v5  ;;  %842 = vmatprep.subr.bf16.mxu1 %v841_v6  ;;  %v293_v5 = vld [vmem:[%s1917_s1 + $0x138] sm:$0xff]  ;;  %v256_v6 = vld [vmem:[%s1917_s1 + $0x10] sm:$0xff] }
  0x67   :  { %970 = vmatprep.subr.bf16.mxu0 %v969_v10  ;;  %v273_v10 = vld [vmem:[%s1917_s1 + $0x98] sm:$0xff] }
  0x69   :  { %844 = vmatpush1.bf16.msra.mxu1 %v843_v16 }
  0x6a   :  { %972 = vmatpush1.bf16.msra.mxu0 %v971_v17  ;;  %846 = vmatprep.subr.bf16.mxu1 %v845_v18 }
  0x6b   :  { %974 = vmatprep.subr.bf16.mxu0 %v973_v22 }
  0x6d   :  { %848 = vmatpush1.bf16.msra.mxu1 %v847_v28 }
  0x6e   :  { %976 = vmatpush1.bf16.msra.mxu0 %v975_v29  ;;  %850 = vmatprep.subr.bf16.mxu1 %v849_v30 }
  0x6f   :  { %978 = vmatprep.subr.bf16.mxu0 %v977_v34 }
  0x71   :  { %852 = vmatpush1.bf16.msra.mxu1 %v851_v38 }
  0x72   :  { %980 = vmatpush1.bf16.msra.mxu0 %v979_v39  ;;  %854 = vmatprep.subr.bf16.mxu1 %v853_v40 }
  0x75   :  { %660 = vmatmul.mubr.f32.vlgmr.msra.gmra.mrb[0].mxu0 %v260_v46  ;;  %856 = vmatpush1.bf16.msra.mxu1 %v855_v45 }
  0x76   :  { %737 = vmatprep.mubr.msk.f32.mxu0 %vm294_vm0, %v269_v50  ;;  %858 = vmatprep.subr.bf16.mxu1 %v857_v47 }
  0x79   :  { %666 = vmatmul.mubr.f32.gmra.mrb[2].mxu0 %v268_v54  ;;  %860 = vmatpush1.bf16.msra.mxu1 %v859_v53 }
  0x7a   :  { %738 = vmatprep.mubr.msk.f32.mxu0 %vm294_vm0, %v277_v58  ;;  %862 = vmatprep.subr.bf16.mxu1 %v861_v55 }
  0x7d   :  { %672 = vmatmul.mubr.f32.gmra.mrb[4].mxu0 %v276_v62  ;;  %864 = vmatpush1.bf16.msra.mxu1 %v863_v61 }
  0x7e   :  { %739 = vmatprep.mubr.msk.f32.mxu0 %vm294_vm0, %v285_v2  ;;  %866 = vmatprep.subr.bf16.mxu1 %v865_v63 }
  0x81   :  { %678 = vmatmul.mubr.f32.gmra.mrb[6].mxu0 %v284_v4  ;;  %868 = vmatpush1.bf16.msra.mxu1 %v867_v3  ;;  %v719_v4 = vld [vmem:[%s1918_s2 + $0x18] sm:$0xff] }
  0x82   :  { %740 = vmatprep.mubr.msk.f32.mxu0 %vm294_vm0, %v293_v5 }
  0x84   :  { %470 = vmatmul.mubr.f32.vlgmr.msra.gmra.mrb[0].mxu1 %v256_v6 }
  0x85   :  { %684 = vmatmul.mubr.f32.gmra.mrb[8].mxu0 %v292_v7  ;;  %475 = vmatprep.mubr.f32.mxu1 %v265_v8  ;;  %v720_v8 = vld [vmem:[%s1918_s2 + $0x20] sm:$0xff] }
  0x88   :  { %476 = vmatmul.mubr.f32.gmra.mrb[2].mxu1 %v264_v9 }
  0x89   :  { %481 = vmatprep.mubr.f32.mxu1 %v273_v10 }
  0x8c   :  { %482 = vmatmul.mubr.f32.gmra.mrb[4].mxu1 %v272_v11 }
  0x8d   :  { %487 = vmatprep.mubr.f32.mxu1 %v281_v12 }
  0x90   :  { %488 = vmatmul.mubr.f32.gmra.mrb[6].mxu1 %v280_v13 }
  0x91   :  { %493 = vmatprep.mubr.f32.mxu1 %v289_v14 }
  0x94   :  { %494 = vmatmul.mubr.f32.gmra.mrb[8].mxu1 %v288_v15 }
 0x148   :  { %v661_v16 = vpop.f32.mrb[0].mxu0 }
 0x149   :  { %v663_v17 = vpop.f32.mrb[1].mxu0 }
 0x14c   :  { %v667_v18 = vpop.f32.mrb[2].mxu0 }
 0x14d   :  { %v669_v19 = vpop.f32.mrb[3].mxu0 }
 0x150   :  { %v673_v20 = vpop.f32.mrb[4].mxu0 }
 0x151   :  { %v675_v21 = vpop.f32.mrb[5].mxu0 }
 0x154   :  { %v679_v22 = vpop.f32.mrb[6].mxu0 }
 0x155   :  { %v681_v23 = vpop.f32.mrb[7].mxu0 }
 0x157   :  { %v471_v24 = vpop.f32.mrb[0].mxu1 }
 0x158   :  { %v981_v25 = vadd.f32 %v661_v16, %v471_v24  ;;  %v685_v26 = vpop.f32.mrb[8].mxu0  ;;  %v473_v27 = vpop.f32.mrb[1].mxu1 }
 0x159   :  { %v982_v28 = vadd.f32 %v663_v17, %v473_v27  ;;  %v687_v29 = vpop.f32.mrb[9].mxu0 }
 0x15b   :  { %v477_v30 = vpop.f32.mrb[2].mxu1  ;;  %v691_v31 = vsel %vm690_vm1, %v982_v28, 0.0 }
 0x15c   :  { %v983_v32 = vadd.f32 %v667_v18, %v477_v30  ;;  %v479_v33 = vpop.f32.mrb[3].mxu1  ;;  %v692_v34 = vadd.f32 %v981_v25, %v691_v31 }
 0x15d   :  { %v984_v35 = vadd.f32 %v669_v19, %v479_v33 }
 0x15e   :  { %693 = vadd.xlane.f32.xlu0 %v692_v34 }
 0x15f   :  { %v483_v36 = vpop.f32.mrb[4].mxu1  ;;  %v695_v37 = vsel %vm690_vm1, %v984_v35, 0.0 }
 0x160   :  { %v985_v38 = vadd.f32 %v673_v20, %v483_v36  ;;  %v485_v39 = vpop.f32.mrb[5].mxu1  ;;  %v696_v40 = vadd.f32 %v983_v32, %v695_v37 }
 0x161   :  { %v986_v41 = vadd.f32 %v675_v21, %v485_v39 }
 0x162   :  { %697 = vadd.xlane.f32.xlu0 %v696_v40 }
 0x163   :  { %v489_v42 = vpop.f32.mrb[6].mxu1  ;;  %v699_v43 = vsel %vm690_vm1, %v986_v41, 0.0 }
 0x164   :  { %v987_v44 = vadd.f32 %v679_v22, %v489_v42  ;;  %v491_v45 = vpop.f32.mrb[7].mxu1  ;;  %v700_v46 = vadd.f32 %v985_v38, %v699_v43 }
 0x165   :  { %v988_v47 = vadd.f32 %v681_v23, %v491_v45 }
 0x166   :  { %701 = vadd.xlane.f32.xlu1 %v700_v46 }
 0x167   :  { %v495_v48 = vpop.f32.mrb[8].mxu1  ;;  %v703_v49 = vsel %vm690_vm1, %v988_v47, 0.0 }
 0x168   :  { %v989_v50 = vadd.f32 %v685_v26, %v495_v48  ;;  %v497_v51 = vpop.f32.mrb[9].mxu1  ;;  %v704_v52 = vadd.f32 %v987_v44, %v703_v49 }
 0x169   :  { %v990_v53 = vadd.f32 %v687_v29, %v497_v51 }
 0x16a   :  { %705 = vadd.xlane.f32.xlu1 %v704_v52 }
 0x16b   :  { %v707_v54 = vsel %vm690_vm1, %v990_v53, 0.0 }
 0x16c   :  { %v708_v55 = vadd.f32 %v989_v50, %v707_v54 }
 0x16e   :  { %709 = vadd.xlane.f32.xlu0 %v708_v55 }
 0x1eb   :  { %v694_v57 = vpop.xlane.xlu0 %693 }
 0x1ec   :  { %v711_v58 = vmul.f32 0.0051020407, %v694_v57 }
 0x1ee   :  { %v721_v59 = vadd.f32 %v716_v56, %v711_v58 }
 0x1ef   :  { %v698_v61 = vpop.xlane.xlu0 %697 }
 0x1f0   :  { %727 = vst.msk [vmem:[%s1919_s3] sm:$0xff] %vm726_vm2, %v721_v59  ;;  %v712_v62 = vmul.f32 0.0051020407, %v698_v61 }
 0x1f2   :  { %v722_v63 = vadd.f32 %v717_v60, %v712_v62 }
 0x1f3   :  { %v702_v1 = vpop.xlane.xlu1 %701 }
 0x1f4   :  { %728 = vst.msk [vmem:[%s1919_s3 + $0x8] sm:$0xff] %vm726_vm2, %v722_v63  ;;  %v713_v2 = vmul.f32 0.0051020407, %v702_v1 }
 0x1f6   :  { %v723_v3 = vadd.f32 %v718_v0, %v713_v2 }
 0x1f7   :  { %v706_v5 = vpop.xlane.xlu1 %705 }
 0x1f8   :  { %729 = vst.msk [vmem:[%s1919_s3 + $0x10] sm:$0xff] %vm726_vm2, %v723_v3  ;;  %v714_v6 = vmul.f32 0.0051020407, %v706_v5 }
 0x1fa   :  { %v724_v7 = vadd.f32 %v719_v4, %v714_v6 }
 0x1fb   :  { %v710_v9 = vpop.xlane.xlu0 %709 }
 0x1fc   :  { %730 = vst.msk [vmem:[%s1919_s3 + $0x18] sm:$0xff] %vm726_vm2, %v724_v7  ;;  %v715_v10 = vmul.f32 0.0051020407, %v710_v9 }
 0x1fe   :  { %v725_v11 = vadd.f32 %v720_v8, %v715_v10 }
 0x200   :  { %731 = vst.msk [vmem:[%s1919_s3 + $0x20] sm:$0xff] %vm726_vm2, %v725_v11 }

</bundles_post_ra>
